<compile_context>
chip_gen: v7x
topology: tpu7x:2x2x1
jax: 0.10.0
libtpu: 0.0.40
codegen_flags: <defaults>
</compile_context>

<pallas_src>
import functools

import numpy as np
import jax
import jax.numpy as jnp
from jax.experimental import pallas as pl
from jax.experimental.pallas import tpu as pltpu


def _pool3d_kernel(x_ref, invc_ref, dm_ref, dp_ref, wm_ref, wp_ref,
                   hm_ref, hp_ref, o_ref, *, D):
    """One grid step: TC fused (b, c) volumes viewed as [TC*H, W*D_padded].

    x_ref / o_ref : [rows, WDp]   rows = TC*H, lane dim = padded W*D
    invc_ref      : [rows, WDp]   precomputed 1/count (0 on lane padding)
    dm/dp/wm/wp   : [1, WDp]      lane masks for d-1/d+1/w-1/w+1 neighbors
    hm/hp         : [rows, 1]     row masks for h-1/h+1 neighbors (zero at channel edges)
    """
    rows, wdp = x_ref.shape
    x = x_ref[...].astype(jnp.float32)

    # D axis: lane shift +-1, boundaries handled by precomputed lane masks.
    s = (x
         + pltpu.roll(x, shift=1, axis=1) * dm_ref[...]
         + pltpu.roll(x, shift=wdp - 1, axis=1) * dp_ref[...])
    # W axis: lane shift +-D.
    s = (s
         + pltpu.roll(s, shift=D, axis=1) * wm_ref[...]
         + pltpu.roll(s, shift=wdp - D, axis=1) * wp_ref[...])
    # H axis: sublane shift +-1; row masks zero the channel-edge wraparound.
    s = (s
         + pltpu.roll(s, shift=1, axis=0) * hm_ref[...]
         + pltpu.roll(s, shift=rows - 1, axis=0) * hp_ref[...])

    o_ref[...] = (s * invc_ref[...] - x).astype(o_ref.dtype)


def _taps(n):
    i = np.arange(n)
    return 3.0 - (i == 0) - (i == n - 1)


def _choose_tc(bc, h, wdp, itemsize):
    """Pick #channels fused per grid step: ~<=1 MiB f32 working block, (tc*h)%8==0,
    prefer >=2 grid steps so both v7x TensorCores stay busy."""
    per_ch = h * wdp * max(itemsize, 4)
    target = 1 << 20
    divisors = [d for d in range(1, bc + 1) if bc % d == 0]
    ok = [d for d in divisors if (d * h) % 8 == 0 or d == bc]
    fit = [d for d in ok if d * per_ch <= target]
    if not fit:
        return min(ok)
    pref = [d for d in fit if bc // d >= 2]
    return max(pref) if pref else max(fit)


def pooling_forward(x, pool_size=3):
    """x: [B, C, H, W, D] -> AvgPool3d(3, 1, 1, count_include_pad=False)(x) - x."""
    if pool_size != 3:
        # TODO(synk): generalize the separable window to pool_size != 3 (module default is 3).
        raise NotImplementedError("only pool_size=3 is implemented")

    B, C, H, W, D = x.shape
    BC, WD = B * C, W * D
    WDp = ((WD + 127) // 128) * 128          # lane-density guard
    itemsize = jnp.dtype(x.dtype).itemsize

    xf = x.reshape(BC * H, WD)               # pure metadata reshape, no transpose
    if WDp != WD:
        xf = jnp.pad(xf, ((0, 0), (0, WDp - WD)))

    TC = _choose_tc(BC, H, WDp, itemsize)
    rows = TC * H
    grid = BC // TC

    # ---- precomputed boundary masks & reciprocal counts (trace-time constants) ----
    lane = np.arange(WDp)
    valid = lane < WD
    d_idx = lane % D
    m_dm = ((d_idx > 0) & valid).astype(np.float32)[None, :]
    m_dp = ((d_idx < D - 1) & valid).astype(np.float32)[None, :]
    m_wm = ((lane >= D) & valid).astype(np.float32)[None, :]
    m_wp = ((lane < WD - D) & valid).astype(np.float32)[None, :]

    r = np.arange(rows)
    m_hm = ((r % H) > 0).astype(np.float32)[:, None]
    m_hp = ((r % H) < H - 1).astype(np.float32)[:, None]

    cnt = (_taps(H)[:, None, None] * _taps(W)[None, :, None] * _taps(D)[None, None, :])
    invc = np.zeros((H, WDp), np.float32)
    invc[:, :WD] = (1.0 / cnt).reshape(H, WD)
    invc = np.tile(invc, (TC, 1))            # [rows, WDp], batch-invariant, stays resident

    # VMEM budget: double-buffered in/out blocks + resident constants + f32 temporaries.
    blk_in = rows * WDp * itemsize
    blk_f32 = rows * WDp * 4
    vmem_bytes = int(min(24 << 20, max(4 << 20, 4 * blk_in + 12 * blk_f32)))

    def const_spec(shape):
        return pl.BlockSpec(shape, lambda i: (0, 0))

    out = pl.pallas_call(
        functools.partial(_pool3d_kernel, D=D),
        out_shape=jax.ShapeDtypeStruct((BC * H, WDp), x.dtype),
        grid_spec=pltpu.PrefetchScalarGridSpec(
            num_scalar_prefetch=0,
            grid=(grid,),
            in_specs=[
                pl.BlockSpec((rows, WDp), lambda i: (i, 0)),   # x block (TC channels)
                const_spec((rows, WDp)),                        # 1/count
                const_spec((1, WDp)),                           # d-1 lane mask
                const_spec((1, WDp)),                           # d+1 lane mask
                const_spec((1, WDp)),                           # w-1 lane mask
                const_spec((1, WDp)),                           # w+1 lane mask
                const_spec((rows, 1)),                          # h-1 row mask
                const_spec((rows, 1)),                          # h+1 row mask
            ],
            out_specs=pl.BlockSpec((rows, WDp), lambda i: (i, 0)),
        ),
        compiler_params=pltpu.CompilerParams(
            dimension_semantics=("parallel",),                  # fused volumes are independent
            vmem_limit_bytes=vmem_bytes,
        ),
    )(xf, invc, m_dm, m_dp, m_wm, m_wp, m_hm, m_hp)

    if WDp != WD:
        out = out[:, :WD]
    return out.reshape(B, C, H, W, D)


def _reference(x):
    """Pure-JAX reference mirroring PyTorch AvgPool3d(3,1,1,count_include_pad=False)(x) - x."""
    B, C, H, W, D = x.shape
    xf = x.astype(jnp.float32)
    pad = jnp.pad(xf, ((0, 0), (0, 0), (1, 1), (1, 1), (1, 1)))
    acc = jnp.zeros_like(xf)
    for dh in range(3):
        for dw in range(3):
            for dd in range(3):
                acc = acc + pad[:, :, dh:dh + H, dw:dw + W, dd:dd + D]
    cnt = jnp.asarray(
        _taps(H)[:, None, None] * _taps(W)[None, :, None] * _taps(D)[None, None, :],
        jnp.float32)
    pooled = acc / cnt
    return (pooled - xf).astype(x.dtype)


if __name__ == "__main__":
    B, C, H, W, D = 2, 4, 16, 16, 16
    key = jax.random.PRNGKey(0)
    x = jax.random.normal(key, (B, C, H, W, D), jnp.float32)

    fwd = jax.jit(pooling_forward)
    out = jax.block_until_ready(fwd(x))
    ref = jax.block_until_ready(_reference(x))

    assert out.shape == x.shape and out.dtype == x.dtype
    max_err = float(jnp.max(jnp.abs(out - ref)))
    assert max_err < 1e-4, f"mismatch vs reference: {max_err}"
    print("KERNEL_OK")
</pallas_src>

<mosaic_0001>
module attributes {stable_mosaic.version = 11 : i64} {
  func.func @_pool3d_kernel(%arg0: i32, %arg1: memref<64x256xf32, #tpu.memory_space<vmem>>, %arg2: memref<64x256xf32, #tpu.memory_space<vmem>>, %arg3: memref<1x256xf32, #tpu.memory_space<vmem>>, %arg4: memref<1x256xf32, #tpu.memory_space<vmem>>, %arg5: memref<1x256xf32, #tpu.memory_space<vmem>>, %arg6: memref<1x256xf32, #tpu.memory_space<vmem>>, %arg7: memref<64x1xf32, #tpu.memory_space<vmem>>, %arg8: memref<64x1xf32, #tpu.memory_space<vmem>>, %arg9: memref<64x256xf32, #tpu.memory_space<vmem>>) attributes {dimension_semantics = [#tpu.dimension_semantics<parallel>], iteration_bounds = array<i64: 2>, scalar_prefetch = 0 : i64, scratch_operands = 0 : i64, tpu.core_type = #tpu.core_type<tc>, window_params = [{transform_indices = @transform_0, window_bounds = array<i64: 64, 256>}, {pipeline_mode = #tpu.pipeline_mode<synchronous>, transform_indices = @transform_1, window_bounds = array<i64: 64, 256>}, {pipeline_mode = #tpu.pipeline_mode<synchronous>, transform_indices = @transform_2, window_bounds = array<i64: 1, 256>}, {pipeline_mode = #tpu.pipeline_mode<synchronous>, transform_indices = @transform_3, window_bounds = array<i64: 1, 256>}, {pipeline_mode = #tpu.pipeline_mode<synchronous>, transform_indices = @transform_4, window_bounds = array<i64: 1, 256>}, {pipeline_mode = #tpu.pipeline_mode<synchronous>, transform_indices = @transform_5, window_bounds = array<i64: 1, 256>}, {pipeline_mode = #tpu.pipeline_mode<synchronous>, transform_indices = @transform_6, window_bounds = array<i64: 64, 1>}, {pipeline_mode = #tpu.pipeline_mode<synchronous>, transform_indices = @transform_7, window_bounds = array<i64: 64, 1>}, {transform_indices = @transform_8, window_bounds = array<i64: 64, 256>}]} {
    %c0 = arith.constant 0 : index
    %c0_0 = arith.constant 0 : index
    %0 = vector.load %arg1[%c0, %c0_0] : memref<64x256xf32, #tpu.memory_space<vmem>>, vector<64x256xf32>
    %c1_i32 = arith.constant 1 : i32
    %1 = tpu.dynamic_rotate %0 by %c1_i32 dim 1 : vector<64x256xf32>, i32 -> vector<64x256xf32>
    %c0_1 = arith.constant 0 : index
    %c0_2 = arith.constant 0 : index
    %2 = vector.load %arg3[%c0_1, %c0_2] : memref<1x256xf32, #tpu.memory_space<vmem>>, vector<1x256xf32>
    %3 = vector.broadcast %2 : vector<1x256xf32> to vector<64x256xf32>
    %4 = arith.mulf %1, %3 : vector<64x256xf32>
    %5 = arith.addf %0, %4 : vector<64x256xf32>
    %c255_i32 = arith.constant 255 : i32
    %6 = tpu.dynamic_rotate %0 by %c255_i32 dim 1 : vector<64x256xf32>, i32 -> vector<64x256xf32>
    %c0_3 = arith.constant 0 : index
    %c0_4 = arith.constant 0 : index
    %7 = vector.load %arg4[%c0_3, %c0_4] : memref<1x256xf32, #tpu.memory_space<vmem>>, vector<1x256xf32>
    %8 = vector.broadcast %7 : vector<1x256xf32> to vector<64x256xf32>
    %9 = arith.mulf %6, %8 : vector<64x256xf32>
    %10 = arith.addf %5, %9 : vector<64x256xf32>
    %c16_i32 = arith.constant 16 : i32
    %11 = tpu.dynamic_rotate %10 by %c16_i32 dim 1 : vector<64x256xf32>, i32 -> vector<64x256xf32>
    %c0_5 = arith.constant 0 : index
    %c0_6 = arith.constant 0 : index
    %12 = vector.load %arg5[%c0_5, %c0_6] : memref<1x256xf32, #tpu.memory_space<vmem>>, vector<1x256xf32>
    %13 = vector.broadcast %12 : vector<1x256xf32> to vector<64x256xf32>
    %14 = arith.mulf %11, %13 : vector<64x256xf32>
    %15 = arith.addf %10, %14 : vector<64x256xf32>
    %c240_i32 = arith.constant 240 : i32
    %16 = tpu.dynamic_rotate %10 by %c240_i32 dim 1 : vector<64x256xf32>, i32 -> vector<64x256xf32>
    %c0_7 = arith.constant 0 : index
    %c0_8 = arith.constant 0 : index
    %17 = vector.load %arg6[%c0_7, %c0_8] : memref<1x256xf32, #tpu.memory_space<vmem>>, vector<1x256xf32>
    %18 = vector.broadcast %17 : vector<1x256xf32> to vector<64x256xf32>
    %19 = arith.mulf %16, %18 : vector<64x256xf32>
    %20 = arith.addf %15, %19 : vector<64x256xf32>
    %c1_i32_9 = arith.constant 1 : i32
    %21 = tpu.dynamic_rotate %20 by %c1_i32_9 dim 0 : vector<64x256xf32>, i32 -> vector<64x256xf32>
    %c0_10 = arith.constant 0 : index
    %c0_11 = arith.constant 0 : index
    %22 = vector.load %arg7[%c0_10, %c0_11] : memref<64x1xf32, #tpu.memory_space<vmem>>, vector<64x1xf32>
    %23 = vector.broadcast %22 : vector<64x1xf32> to vector<64x256xf32>
    %24 = arith.mulf %21, %23 : vector<64x256xf32>
    %25 = arith.addf %20, %24 : vector<64x256xf32>
    %c63_i32 = arith.constant 63 : i32
    %26 = tpu.dynamic_rotate %20 by %c63_i32 dim 0 : vector<64x256xf32>, i32 -> vector<64x256xf32>
    %c0_12 = arith.constant 0 : index
    %c0_13 = arith.constant 0 : index
    %27 = vector.load %arg8[%c0_12, %c0_13] : memref<64x1xf32, #tpu.memory_space<vmem>>, vector<64x1xf32>
    %28 = vector.broadcast %27 : vector<64x1xf32> to vector<64x256xf32>
    %29 = arith.mulf %26, %28 : vector<64x256xf32>
    %30 = arith.addf %25, %29 : vector<64x256xf32>
    %c0_14 = arith.constant 0 : index
    %c0_15 = arith.constant 0 : index
    %31 = vector.load %arg2[%c0_14, %c0_15] : memref<64x256xf32, #tpu.memory_space<vmem>>, vector<64x256xf32>
    %32 = arith.mulf %30, %31 : vector<64x256xf32>
    %33 = arith.subf %32, %0 : vector<64x256xf32>
    %c0_16 = arith.constant 0 : index
    %c0_17 = arith.constant 0 : index
    %34 = vector.load %arg9[%c0_16, %c0_17] : memref<64x256xf32, #tpu.memory_space<vmem>>, vector<64x256xf32>
    tpu.vector_store %arg9[%c0_16, %c0_17], %33 {strides = array<i32>} : memref<64x256xf32, #tpu.memory_space<vmem>>, vector<64x256xf32>,
    return
  }
  func.func @transform_0(%arg0: i32) -> (i32, i32) {
    %c0_i32 = arith.constant 0 : i32
    %c0_i32_0 = arith.constant 0 : i32
    return %arg0, %c0_i32 : i32, i32
  }
  func.func @transform_1(%arg0: i32) -> (i32, i32) {
    %c0_i32 = arith.constant 0 : i32
    %c0_i32_0 = arith.constant 0 : i32
    %c0_i32_1 = arith.constant 0 : i32
    return %c0_i32, %c0_i32_0 : i32, i32
  }
  func.func @transform_2(%arg0: i32) -> (i32, i32) {
    %c0_i32 = arith.constant 0 : i32
    %c0_i32_0 = arith.constant 0 : i32
    %c0_i32_1 = arith.constant 0 : i32
    return %c0_i32, %c0_i32_0 : i32, i32
  }
  func.func @transform_3(%arg0: i32) -> (i32, i32) {
    %c0_i32 = arith.constant 0 : i32
    %c0_i32_0 = arith.constant 0 : i32
    %c0_i32_1 = arith.constant 0 : i32
    return %c0_i32, %c0_i32_0 : i32, i32
  }
  func.func @transform_4(%arg0: i32) -> (i32, i32) {
    %c0_i32 = arith.constant 0 : i32
    %c0_i32_0 = arith.constant 0 : i32
    %c0_i32_1 = arith.constant 0 : i32
    return %c0_i32, %c0_i32_0 : i32, i32
  }
  func.func @transform_5(%arg0: i32) -> (i32, i32) {
    %c0_i32 = arith.constant 0 : i32
    %c0_i32_0 = arith.constant 0 : i32
    %c0_i32_1 = arith.constant 0 : i32
    return %c0_i32, %c0_i32_0 : i32, i32
  }
  func.func @transform_6(%arg0: i32) -> (i32, i32) {
    %c0_i32 = arith.constant 0 : i32
    %c0_i32_0 = arith.constant 0 : i32
    %c0_i32_1 = arith.constant 0 : i32
    return %c0_i32, %c0_i32_0 : i32, i32
  }
  func.func @transform_7(%arg0: i32) -> (i32, i32) {
    %c0_i32 = arith.constant 0 : i32
    %c0_i32_0 = arith.constant 0 : i32
    %c0_i32_1 = arith.constant 0 : i32
    return %c0_i32, %c0_i32_0 : i32, i32
  }
  func.func @transform_8(%arg0: i32) -> (i32, i32) {
    %c0_i32 = arith.constant 0 : i32
    %c0_i32_0 = arith.constant 0 : i32
    return %arg0, %c0_i32 : i32, i32
  }
}

</mosaic_0001>

<bundles_post_ra>
// kernel: pooling_forward.1
= control target key start
LH: loop header
LB: loop body
LE: loop exit
PB: predicated region body
PF: predicated region fallthrough
CT: control target
= control target key end

     0   :  { %s1158_s27 = smov 0   ;;  %s2136_s0 = inlined_call_operand.vmem [shape: f32[128,256], index: 0, kind: input, shape index: {}]   ;;  %s2137_s1 = inlined_call_operand.vmem [shape: f32[64,256], index: 1, kind: input, shape index: {}]   ;;  %s2138_s2 = inlined_call_operand.vmem [shape: f32[1,256], index: 2, kind: input, shape index: {}]   ;;  %s2139_s3 = inlined_call_operand.vmem [shape: f32[1,256], index: 3, kind: input, shape index: {}]   ;;  %s2140_s4 = inlined_call_operand.vmem [shape: f32[1,256], index: 4, kind: input, shape index: {}]   ;;  %s2141_s5 = inlined_call_operand.vmem [shape: f32[1,256], index: 5, kind: input, shape index: {}]   ;;  %s2142_s6 = inlined_call_operand.vmem [shape: f32[64,1], index: 6, kind: input, shape index: {}]   ;;  %s2143_s7 = inlined_call_operand.vmem [shape: f32[64,1], index: 7, kind: input, shape index: {}]   ;;  %s2144_s8 = inlined_call_operand.vmem [shape: f32[128,256], index: 8, kind: output, shape index: {}]  }
   0x1 LB: > { %s1054_s28 = sadd.s32 4294967295, %s1106_s27   ;;  %p1058_p0 = scmp.ge.s32.totalorder %s1106_s27, 1  ;;  %s1106_s27 = sphi %s1158_s27, %s18_s27  }
   0x2   : > { %p264_p1 = scmp.lt.s32.totalorder %s1106_s27, 3 }
   0x4   : > { %p265_p2 = pnand %p1058_p0, %p264_p1 }
   0x6   : > { %268 = sbr.rel (%p265_p2) target bundleno = 419 (0x1a3), region = 52 }
   0xd   : > { %s1059_s29 = sshll.u32 %s1054_s28, 3  ;;  %s1108_s12 = smov 1   ;;  %v1110_v16 = vmov 0   ;;  %v362_v33 = vlaneseq  ;;  %v381_v41 = vld [vmem:[%s2138_s2] sm:$0x3] }
   0xe   : > { %p301_p3 = scmp.lt.s32.totalorder %s1059_s29, 15  ;;  %s1109_s13 = smov 127   ;;  %1083 = vset.pattern.permute.xlu1 %v1110_v16  ;;  %1082 = vset.pattern.permute.xlu0 %v1110_v16  ;;  %v474_v47 = vld [vmem:[%s2139_s3] sm:$0x3] }
   0xf   : > { %v1292_v36 = vshrl.u32 %v362_v33, 7  ;;  %v1294_v37 = vand.u32 127, %v362_v33  ;;  %s1111_s18 = smov 16   ;;  %s1112_s19 = smov 112  }
  0x10   : > { %s2173_s29 = smov (!%p301_p3, %s1059_s29), 15 }
  0x11   : > { %s1067_s30 = sshll.u32 %s2173_s29, 4  ;;  %2159 = vst [vmem:[#allocation3_spill] sm:$0xff] %v1292_v36  ;;  %v1301_v40 = vsub.s32 0, %v1292_v36  ;;  %vm364_vm0 = vcmp.lt.s32.totalorder %v1294_v37, 1  ;;  %vm457_vm1 = vcmp.lt.s32.totalorder %v1294_v37, 127  ;;  %vm550_vm2 = vcmp.lt.s32.totalorder %v1294_v37, 16 }
  0x12   : > { %s1174_s11 = scalar_lea.vmem %s2136_s0, %s1067_s30  ;;  %vm643_vm3 = vcmp.lt.s32.totalorder %v1294_v37, 112 }
  0x13   : > { %v1177_v0 = vld [vmem:[%s1174_s11 + $0x20] sm:$0xff]  ;;  %v1185_v2 = vld [vmem:[%s1174_s11 + $0x30] sm:$0xff]  ;;  %v1209_v8 = vld [vmem:[%s1174_s11 + $0x18] sm:$0xff]  ;;  %2160 = vst [vmem:[#allocation4_spill] sm:$0xff] %v1301_v40  ;;  %v386_v44 = vrot.slane %v381_v41, %v1301_v40  ;;  %v479_v54 = vrot.slane %v474_v47, %v1301_v40 }
  0x14   : > { %v1180_v1 = vld [vmem:[%s1174_s11] sm:$0xff]  ;;  %334 = vrot.lane.b32.xlu1 %v1177_v0, %s1108_s12  ;;  %v1188_v3 = vld [vmem:[%s1174_s11 + $0x10] sm:$0xff]  ;;  %v1212_v9 = vld [vmem:[%s1174_s11 + $0x8] sm:$0xff] }
  0x15   : > { %330 = vrot.lane.b32.xlu0 %v1180_v1, %s1108_s12  ;;  %v1193_v4 = vld [vmem:[%s1174_s11 + $0x50] sm:$0xff]  ;;  %v1196_v5 = vld [vmem:[%s1174_s11 + $0x40] sm:$0xff]  ;;  %v1217_v10 = vld [vmem:[%s1174_s11 + $0x38] sm:$0xff] }
  0x16   : > { %v1201_v6 = vld [vmem:[%s1174_s11 + $0x70] sm:$0xff]  ;;  %v1204_v7 = vld [vmem:[%s1174_s11 + $0x60] sm:$0xff]  ;;  %v1220_v11 = vld [vmem:[%s1174_s11 + $0x28] sm:$0xff] }
  0x17   : > { %v1225_v12 = vld [vmem:[%s1174_s11 + $0x58] sm:$0xff]  ;;  %v1228_v13 = vld [vmem:[%s1174_s11 + $0x48] sm:$0xff] }
  0x18   : > { %336 = vrot.lane.b32.xlu1 %v1185_v2, %s1108_s12  ;;  %v1233_v14 = vld [vmem:[%s1174_s11 + $0x78] sm:$0xff]  ;;  %v1236_v15 = vld [vmem:[%s1174_s11 + $0x68] sm:$0xff] }
  0x19   : > { %332 = vrot.lane.b32.xlu0 %v1188_v3, %s1108_s12  ;;  %2158 = vst [vmem:[#allocation2_spill] sm:$0xff] %v1236_v15 }
  0x1c   : > { %340 = vrot.lane.b32.xlu1 %v1193_v4, %s1108_s12 }
  0x1d   : > { %338 = vrot.lane.b32.xlu0 %v1196_v5, %s1108_s12 }
  0x20   : > { %344 = vrot.lane.b32.xlu1 %v1201_v6, %s1108_s12 }
  0x21   : > { %342 = vrot.lane.b32.xlu0 %v1204_v7, %s1108_s12 }
  0x24   : > { %348 = vrot.lane.b32.xlu1 %v1209_v8, %s1108_s12 }
  0x25   : > { %346 = vrot.lane.b32.xlu0 %v1212_v9, %s1108_s12 }
  0x28   : > { %352 = vrot.lane.b32.xlu1 %v1217_v10, %s1108_s12 }
  0x29   : > { %350 = vrot.lane.b32.xlu0 %v1220_v11, %s1108_s12 }
  0x2c   : > { %356 = vrot.lane.b32.xlu1 %v1225_v12, %s1108_s12 }
  0x2d   : > { %354 = vrot.lane.b32.xlu0 %v1228_v13, %s1108_s12 }
  0x30   : > { %360 = vrot.lane.b32.xlu1 %v1233_v14, %s1108_s12 }
  0x31   : > { %358 = vrot.lane.b32.xlu0 %v1236_v15, %s1108_s12  ;;  %s2041_s12 = scalar_lea.vmem %s2144_s8, %s1067_s30 }
  0x34   : > { %427 = vrot.lane.b32.xlu1 %v1188_v3, %s1109_s13 }
  0x35   : > { %425 = vrot.lane.b32.xlu0 %v1180_v1, %s1109_s13 }
  0x38   : > { %431 = vrot.lane.b32.xlu1 %v1185_v2, %s1109_s13 }
  0x39   : > { %429 = vrot.lane.b32.xlu0 %v1177_v0, %s1109_s13 }
  0x3c   : > { %435 = vrot.lane.b32.xlu1 %v1193_v4, %s1109_s13 }
  0x3d   : > { %433 = vrot.lane.b32.xlu0 %v1196_v5, %s1109_s13 }
  0x40   : > { %439 = vrot.lane.b32.xlu1 %v1201_v6, %s1109_s13 }
  0x41   : > { %437 = vrot.lane.b32.xlu0 %v1204_v7, %s1109_s13 }
  0x44   : > { %443 = vrot.lane.b32.xlu1 %v1209_v8, %s1109_s13 }
  0x45   : > { %441 = vrot.lane.b32.xlu0 %v1212_v9, %s1109_s13 }
  0x48   : > { %447 = vrot.lane.b32.xlu1 %v1217_v10, %s1109_s13 }
  0x49   : > { %445 = vrot.lane.b32.xlu0 %v1220_v11, %s1109_s13 }
  0x4c   : > { %451 = vrot.lane.b32.xlu1 %v1225_v12, %s1109_s13 }
  0x4d   : > { %449 = vrot.lane.b32.xlu0 %v1228_v13, %s1109_s13 }
  0x50   : > { %455 = vrot.lane.b32.xlu1 %v1233_v14, %s1109_s13 }
  0x51   : > { %453 = vrot.lane.b32.xlu0 %v1236_v15, %s1109_s13 }
  0x86   : > { %v1256_v17 = vpop.permute.xlu1 %334 }
  0x87   : > { %v1258_v18 = vpop.permute.xlu0 %330 }
  0x8a   : > { %v1260_v19 = vpop.permute.xlu1 %336 }
  0x8b   : > { %v1262_v20 = vpop.permute.xlu0 %332 }
  0x8e   : > { %v1264_v21 = vpop.permute.xlu1 %340 }
  0x8f   : > { %v1266_v22 = vpop.permute.xlu0 %338 }
  0x92   : > { %v1268_v23 = vpop.permute.xlu1 %344 }
  0x93   : > { %v1270_v24 = vpop.permute.xlu0 %342 }
  0x96   : > { %v1272_v25 = vpop.permute.xlu1 %348 }
  0x97   : > { %v1274_v26 = vpop.permute.xlu0 %346  ;;  %v374_v45 = vsel %vm364_vm0, %v1272_v25, %v1262_v20 }
  0x98   : > { %v373_v46 = vsel %vm364_vm0, %v1274_v26, %v1258_v18  ;;  %v395_v50 = vmul.f32 %v386_v44, %v374_v45  ;;  %v1354_v45 = vsub.s32 1, %v1292_v36 }
  0x99   : > { %v393_v52 = vmul.f32 %v386_v44, %v373_v46 }
  0x9a   : > { %v1276_v27 = vpop.permute.xlu1 %352  ;;  %v411_v58 = vadd.f32 %v395_v50, %v1188_v3 }
  0x9b   : > { %v1278_v28 = vpop.permute.xlu0 %350  ;;  %v376_v51 = vsel %vm364_vm0, %v1276_v27, %v1260_v19  ;;  %v409_v62 = vadd.f32 %v393_v52, %v1180_v1 }
  0x9c   : > { %v375_v53 = vsel %vm364_vm0, %v1278_v28, %v1256_v17  ;;  %v399_v55 = vmul.f32 %v386_v44, %v376_v51 }
  0x9d   : > { %v397_v59 = vmul.f32 %v386_v44, %v375_v53 }
  0x9e   : > { %v1280_v29 = vpop.permute.xlu1 %356  ;;  %v415_v46 = vadd.f32 %v399_v55, %v1185_v2 }
  0x9f   : > { %v1282_v30 = vpop.permute.xlu0 %354  ;;  %v378_v63 = vsel %vm364_vm0, %v1280_v29, %v1264_v21  ;;  %v413_v53 = vadd.f32 %v397_v59, %v1177_v0  ;;  %v1381_v59 = vrot.slane %v381_v41, %v1354_v45 }
  0xa0   : > { %v377_v3 = vsel %vm364_vm0, %v1282_v30, %v1266_v22 }
  0xa1   : > { %v401_v40 = vmul.f32 %v386_v44, %v377_v3 }
  0xa2   : > { %v1284_v31 = vpop.permute.xlu1 %360 }
  0xa3   : > { %v1286_v32 = vpop.permute.xlu0 %358  ;;  %v380_v2 = vsel %vm364_vm0, %v1284_v31, %v1268_v23 }
  0xa4   : > { %v379_v0 = vsel %vm364_vm0, %v1286_v32, %v1270_v24 }
  0xa6   : > { %v1288_v34 = vpop.permute.xlu1 %427 }
  0xa7   : > { %v1290_v35 = vpop.permute.xlu0 %425 }
  0xaa   : > { %v1296_v38 = vpop.permute.xlu1 %431 }
  0xab   : > { %v1298_v39 = vpop.permute.xlu0 %429 }
  0xae   : > { %v1307_v42 = vpop.permute.xlu1 %435 }
  0xaf   : > { %v1309_v43 = vpop.permute.xlu0 %433 }
  0xb2   : > { %v1323_v48 = vpop.permute.xlu1 %439 }
  0xb3   : > { %v1325_v49 = vpop.permute.xlu0 %437 }
  0xb6   : > { %v444_v56 = vpop.permute.xlu1 %443 }
  0xb7   : > { %v442_v57 = vpop.permute.xlu0 %441  ;;  %v459_v60 = vsel %vm457_vm1, %v1288_v34, %v444_v56 }
  0xb8   : > { %v458_v61 = vsel %vm457_vm1, %v1290_v35, %v442_v57  ;;  %v488_v16 = vmul.f32 %v479_v54, %v459_v60  ;;  %v403_v60 = vmul.f32 %v386_v44, %v378_v63 }
  0xb9   : > { %v486_v33 = vmul.f32 %v479_v54, %v458_v61 }
  0xba   : > { %v448_v50 = vpop.permute.xlu1 %447  ;;  %v1357_v1 = vadd.f32 %v488_v16, %v411_v58  ;;  %v419_v3 = vadd.f32 %v403_v60, %v1193_v4 }
  0xbb   : > { %v446_v51 = vpop.permute.xlu0 %445  ;;  %v1359_v52 = vadd.f32 %v486_v33, %v409_v62  ;;  %v461_v61 = vsel %vm457_vm1, %v1296_v38, %v448_v50 }
  0xbc   : > { %2161 = vst [vmem:[#allocation5_spill] sm:$0xff] %v1357_v1  ;;  %v460_v36 = vsel %vm457_vm1, %v1298_v39, %v446_v51  ;;  %v492_v55 = vmul.f32 %v479_v54, %v461_v61  ;;  %520 = vrot.lane.b32.xlu1 %v1357_v1, %s1111_s18  ;;  %v407_v61 = vmul.f32 %v386_v44, %v380_v2 }
  0xbd   : > { %2162 = vst [vmem:[#allocation6_spill] sm:$0xff] %v1359_v52  ;;  %v490_v58 = vmul.f32 %v479_v54, %v460_v36  ;;  %518 = vrot.lane.b32.xlu0 %v1359_v52, %s1111_s18  ;;  %v366_v36 = vsel %vm364_vm0, %v1262_v20, %v1272_v25  ;;  %v417_v1 = vadd.f32 %v401_v40, %v1196_v5 }
  0xbe   : > { %v452_v62 = vpop.permute.xlu1 %451  ;;  %v1387_v16 = vadd.f32 %v492_v55, %v415_v46  ;;  %v405_v20 = vmul.f32 %v386_v44, %v379_v0  ;;  %v1402_v46 = vrot.slane %v474_v47, %v1354_v45  ;;  %v396_v4 = vmul.f32 %v1381_v59, %v366_v36 }
  0xbf   : > { %v450_v63 = vpop.permute.xlu0 %449  ;;  %v1389_v33 = vadd.f32 %v490_v58, %v413_v53  ;;  %v463_v52 = vsel %vm457_vm1, %v1307_v42, %v452_v62  ;;  %v365_v53 = vsel %vm364_vm0, %v1258_v18, %v1274_v26  ;;  %v423_v60 = vadd.f32 %v407_v61, %v1201_v6 }
  0xc0   : > { %v462_v41 = vsel %vm457_vm1, %v1309_v43, %v450_v63  ;;  %v496_v25 = vmul.f32 %v479_v54, %v463_v52  ;;  %524 = vrot.lane.b32.xlu1 %v1387_v16, %s1111_s18  ;;  %v467_v47 = vsel %vm457_vm1, %v444_v56, %v1288_v34  ;;  %v421_v26 = vadd.f32 %v405_v20, %v1204_v7 }
  0xc1   : > { %v494_v15 = vmul.f32 %v479_v54, %v462_v41  ;;  %522 = vrot.lane.b32.xlu0 %v1389_v33, %s1111_s18  ;;  %v394_v34 = vmul.f32 %v1381_v59, %v365_v53  ;;  %v368_v56 = vsel %vm364_vm0, %v1260_v19, %v1276_v27  ;;  %v367_v7 = vsel %vm364_vm0, %v1256_v17, %v1278_v28 }
  0xc2   : > { %v456_v5 = vpop.permute.xlu1 %455  ;;  %v1411_v44 = vadd.f32 %v496_v25, %v419_v3  ;;  %v469_v19 = vsel %vm457_vm1, %v448_v50, %v1296_v38  ;;  %v412_v27 = vadd.f32 %v396_v4, %v1209_v8  ;;  %v400_v58 = vmul.f32 %v1381_v59, %v368_v56  ;;  %v2163_v4 = vld [vmem:[#allocation2_spill] sm:$0xff]  ;;  %v855_v56 = vld [vmem:[%s2143_s7 + $0x18] sm:$0xff] }
  0xc3   : > { %v454_v40 = vpop.permute.xlu0 %453  ;;  %v1413_v52 = vadd.f32 %v494_v15, %v417_v1  ;;  %v465_v2 = vsel %vm457_vm1, %v1323_v48, %v456_v5  ;;  %v466_v15 = vsel %vm457_vm1, %v442_v57, %v1290_v35  ;;  %v489_v35 = vmul.f32 %v1402_v46, %v467_v47  ;;  %v742_v47 = vld [vmem:[%s2142_s6 + $0x18] sm:$0xff] }
  0xc4   : > { %v464_v18 = vsel %vm457_vm1, %v1325_v49, %v454_v40  ;;  %v500_v1 = vmul.f32 %v479_v54, %v465_v2  ;;  %528 = vrot.lane.b32.xlu1 %v1411_v44, %s1111_s18  ;;  %v487_v55 = vmul.f32 %v1402_v46, %v466_v15  ;;  %v468_v17 = vsel %vm457_vm1, %v446_v51, %v1298_v39  ;;  %v743_v2 = vld [vmem:[%s2142_s6 + $0x20] sm:$0xff]  ;;  %v746_v15 = vld [vmem:[%s2142_s6 + $0x38] sm:$0xff] }
  0xc5   : > { %v498_v6 = vmul.f32 %v479_v54, %v464_v18  ;;  %526 = vrot.lane.b32.xlu0 %v1413_v52, %s1111_s18  ;;  %v410_v28 = vadd.f32 %v394_v34, %v1212_v9  ;;  %v398_v0 = vmul.f32 %v1381_v59, %v367_v7  ;;  %v370_v38 = vsel %vm364_vm0, %v1264_v21, %v1280_v29  ;;  %v744_v18 = vld [vmem:[%s2142_s6 + $0x28] sm:$0xff]  ;;  %v854_v34 = vld [vmem:[%s2143_s7 + $0x10] sm:$0xff]  ;;  %v856_v7 = vld [vmem:[%s2143_s7 + $0x20] sm:$0xff] }
  0xc6   : > { %v1443_v54 = vadd.f32 %v500_v1, %v423_v60  ;;  %v369_v8 = vsel %vm364_vm0, %v1266_v22, %v1282_v30  ;;  %v493_v39 = vmul.f32 %v1402_v46, %v469_v19  ;;  %v1471_v50 = vadd.f32 %v489_v35, %v412_v27  ;;  %v741_v60 = vld [vmem:[%s2142_s6 + $0x10] sm:$0xff]  ;;  %v852_v1 = vld [vmem:[%s2143_s7] sm:$0xff]  ;;  %v857_v35 = vld [vmem:[%s2143_s7 + $0x28] sm:$0xff] }
  0xc7   : > { %v1445_v57 = vadd.f32 %v498_v6, %v421_v26  ;;  %v491_v9 = vmul.f32 %v1402_v46, %v468_v17  ;;  %v471_v51 = vsel %vm457_vm1, %v452_v62, %v1307_v42  ;;  %v1477_v36 = vadd.f32 %v487_v55, %v410_v28  ;;  %v745_v26 = vld [vmem:[%s2142_s6 + $0x30] sm:$0xff]  ;;  %v853_v6 = vld [vmem:[%s2143_s7 + $0x8] sm:$0xff]  ;;  %v859_v19 = vld [vmem:[%s2143_s7 + $0x38] sm:$0xff] }
  0xc8   : > { %532 = vrot.lane.b32.xlu1 %v1443_v54, %s1111_s18  ;;  %v416_v21 = vadd.f32 %v400_v58, %v1217_v10  ;;  %v404_v29 = vmul.f32 %v1381_v59, %v370_v38  ;;  %v470_v22 = vsel %vm457_vm1, %v450_v63, %v1309_v43  ;;  %v414_v30 = vadd.f32 %v398_v0, %v1220_v11  ;;  %v858_v55 = vld [vmem:[%s2143_s7 + $0x30] sm:$0xff] }
  0xc9   : > { %530 = vrot.lane.b32.xlu0 %v1445_v57, %s1111_s18  ;;  %v402_v3 = vmul.f32 %v1381_v59, %v369_v8  ;;  %v372_v42 = vsel %vm364_vm0, %v1268_v23, %v1284_v31  ;;  %v371_v10 = vsel %vm364_vm0, %v1270_v24, %v1286_v32  ;;  %v497_v43 = vmul.f32 %v1402_v46, %v471_v51 }
  0xca   : > { %v1499_v62 = vadd.f32 %v493_v39, %v416_v21  ;;  %v495_v11 = vmul.f32 %v1402_v46, %v470_v22  ;;  %v473_v63 = vsel %vm457_vm1, %v456_v5, %v1323_v48  ;;  %v1505_v61 = vadd.f32 %v491_v9, %v414_v30  ;;  %v740_v5 = vld [vmem:[%s2142_s6 + $0x8] sm:$0xff] }
  0xcb   : > { %v420_v23 = vadd.f32 %v404_v29, %v1225_v12  ;;  %v408_v31 = vmul.f32 %v1381_v59, %v372_v42  ;;  %v472_v24 = vsel %vm457_vm1, %v454_v40, %v1325_v49  ;;  %v418_v32 = vadd.f32 %v402_v3, %v1228_v13  ;;  %v739_v40 = vld [vmem:[%s2142_s6] sm:$0xff] }
  0xcc   : > { %536 = vrot.lane.b32.xlu1 %v1471_v50, %s1111_s18  ;;  %v406_v41 = vmul.f32 %v1381_v59, %v371_v10  ;;  %v501_v48 = vmul.f32 %v1402_v46, %v473_v63  ;;  %v499_v12 = vmul.f32 %v1402_v46, %v472_v24  ;;  %v2165_v46 = vld [vmem:[#allocation6_spill] sm:$0xff] }
  0xcd   : > { %534 = vrot.lane.b32.xlu0 %v1477_v36, %s1111_s18  ;;  %v1519_v20 = vadd.f32 %v497_v43, %v420_v23  ;;  %v1522_v25 = vadd.f32 %v495_v11, %v418_v32  ;;  %v424_v49 = vadd.f32 %v408_v31, %v1233_v14  ;;  %v2164_v14 = vld [vmem:[#allocation5_spill] sm:$0xff]  ;;  %v567_v11 = vld [vmem:[%s2140_s4] sm:$0x3]  ;;  %v2166_v23 = vld [vmem:[#allocation4_spill] sm:$0xff] }
  0xce   : > { %v422_v13 = vadd.f32 %v406_v41, %v2163_v4  ;;  %v1613_v31 = vrot.slane %v567_v11, %v2166_v23  ;;  %v1616_v24 = vrot.slane %v567_v11, %v1354_v45 }
  0xcf   : > { %v1530_v59 = vadd.f32 %v501_v48, %v424_v49 }
  0xd0   : > { %540 = vrot.lane.b32.xlu1 %v1499_v62, %s1111_s18  ;;  %v1532_v53 = vadd.f32 %v499_v12, %v422_v13 }
  0xd1   : > { %538 = vrot.lane.b32.xlu0 %v1505_v61, %s1111_s18 }
  0xd4   : > { %544 = vrot.lane.b32.xlu1 %v1519_v20, %s1111_s18 }
  0xd5   : > { %542 = vrot.lane.b32.xlu0 %v1522_v25, %s1111_s18 }
  0xd8   : > { %548 = vrot.lane.b32.xlu1 %v1530_v59, %s1111_s18 }
  0xd9   : > { %546 = vrot.lane.b32.xlu0 %v1532_v53, %s1111_s18 }
  0xdc   : > { %613 = vrot.lane.b32.xlu1 %v2164_v14, %s1112_s19 }
  0xdd   : > { %611 = vrot.lane.b32.xlu0 %v2165_v46, %s1112_s19 }
  0xe0   : > { %617 = vrot.lane.b32.xlu1 %v1387_v16, %s1112_s19 }
  0xe1   : > { %615 = vrot.lane.b32.xlu0 %v1389_v33, %s1112_s19 }
  0xe4   : > { %621 = vrot.lane.b32.xlu1 %v1411_v44, %s1112_s19 }
  0xe5   : > { %619 = vrot.lane.b32.xlu0 %v1413_v52, %s1112_s19 }
  0xe8   : > { %625 = vrot.lane.b32.xlu1 %v1443_v54, %s1112_s19 }
  0xe9   : > { %623 = vrot.lane.b32.xlu0 %v1445_v57, %s1112_s19 }
  0xec   : > { %629 = vrot.lane.b32.xlu1 %v1471_v50, %s1112_s19 }
  0xed   : > { %627 = vrot.lane.b32.xlu0 %v1477_v36, %s1112_s19 }
  0xf0   : > { %633 = vrot.lane.b32.xlu1 %v1499_v62, %s1112_s19 }
  0xf1   : > { %631 = vrot.lane.b32.xlu0 %v1505_v61, %s1112_s19 }
  0xf4   : > { %637 = vrot.lane.b32.xlu1 %v1519_v20, %s1112_s19 }
  0xf5   : > { %635 = vrot.lane.b32.xlu0 %v1522_v25, %s1112_s19 }
  0xf8   : > { %754 = vperm.xlu1 %1083, %v740_v5  }
  0xf9   : > { %639 = vrot.lane.b32.xlu0 %v1532_v53, %s1112_s19 }
  0xfc   : > { %641 = vrot.lane.b32.xlu1 %v1530_v59, %s1112_s19 }
  0xfd   : > { %749 = vperm.xlu0 %1082, %v739_v40   ;;  %v660_v40 = vld [vmem:[%s2141_s5] sm:$0x3] }
 0x100   : > { %759 = vperm.xlu1 %1083, %v741_v60  }
 0x101   : > { %764 = vperm.xlu0 %1082, %v742_v47  }
 0x104   : > { %769 = vperm.xlu1 %1083, %v743_v2  }
 0x105   : > { %774 = vperm.xlu0 %1082, %v744_v18  }
 0x108   : > { %779 = vperm.xlu1 %1083, %v745_v26  }
 0x109   : > { %784 = vperm.xlu0 %1082, %v746_v15  }
 0x10c   : > { %862 = vperm.xlu1 %1083, %v852_v1  }
 0x10d   : > { %867 = vperm.xlu0 %1082, %v853_v6  }
 0x110   : > { %872 = vperm.xlu1 %1083, %v854_v34  }
 0x111   : > { %877 = vperm.xlu0 %1082, %v855_v56  }
 0x114   : > { %882 = vperm.xlu1 %1083, %v856_v7  }
 0x115   : > { %887 = vperm.xlu0 %1082, %v857_v35   ;;  %v1655_v35 = vrot.slane %v660_v40, %v2166_v23 }
 0x118   : > { %892 = vperm.xlu1 %1083, %v858_v55   ;;  %v1658_v55 = vrot.slane %v660_v40, %v1354_v45 }
 0x119   : > { %897 = vperm.xlu0 %1082, %v859_v19  }
 0x12e   : > { %v521_v27 = vpop.permute.xlu1 %520 }
 0x12f   : > { %v519_v58 = vpop.permute.xlu0 %518 }
 0x132   : > { %v525_v17 = vpop.permute.xlu1 %524 }
 0x133   : > { %v523_v28 = vpop.permute.xlu0 %522 }
 0x136   : > { %v529_v0 = vpop.permute.xlu1 %528 }
 0x137   : > { %v527_v38 = vpop.permute.xlu0 %526 }
 0x13a   : > { %v1602_v8 = vpop.permute.xlu1 %532 }
 0x13b   : > { %v531_v39 = vpop.permute.xlu0 %530 }
 0x13e   : > { %v537_v9 = vpop.permute.xlu1 %536 }
 0x13f   : > { %v535_v51 = vpop.permute.xlu0 %534  ;;  %v552_v41 = vsel %vm550_vm2, %v521_v27, %v537_v9  ;;  %v560_v48 = vsel %vm550_vm2, %v537_v9, %v521_v27 }
 0x140   : > { %v551_v12 = vsel %vm550_vm2, %v519_v58, %v535_v51  ;;  %v559_v49 = vsel %vm550_vm2, %v535_v51, %v519_v58  ;;  %v581_v60 = vmul.f32 %v1613_v31, %v560_v48  ;;  %v582_v47 = vmul.f32 %v1616_v24, %v552_v41 }
 0x141   : > { %v579_v15 = vmul.f32 %v1613_v31, %v559_v49  ;;  %v580_v1 = vmul.f32 %v1616_v24, %v551_v12  ;;  %v2167_v12 = vld [vmem:[#allocation3_spill] sm:$0xff] }
 0x142   : > { %v541_v21 = vpop.permute.xlu1 %540  ;;  %vm722_vm4 = vcmp.lt.s32.totalorder %v2167_v12, 1  ;;  %vm835_vm5 = vcmp.lt.s32.totalorder %v2167_v12, 7  ;;  %v932_v12 = vld [vmem:[%s2137_s1] sm:$0xff] }
 0x143   : > { %v539_v29 = vpop.permute.xlu0 %538  ;;  %v554_v4 = vsel %vm550_vm2, %v525_v17, %v541_v21  ;;  %v562_v13 = vsel %vm550_vm2, %v541_v21, %v525_v17 }
 0x144   : > { %v553_v2 = vsel %vm550_vm2, %v523_v28, %v539_v29  ;;  %v561_v18 = vsel %vm550_vm2, %v539_v29, %v523_v28  ;;  %v585_v56 = vmul.f32 %v1613_v31, %v562_v13  ;;  %v586_v7 = vmul.f32 %v1616_v24, %v554_v4 }
 0x145   : > { %v583_v19 = vmul.f32 %v1613_v31, %v561_v18  ;;  %v584_v27 = vmul.f32 %v1616_v24, %v553_v2  ;;  %v597_v29 = vadd.f32 %v581_v60, %v2164_v14 }
 0x146   : > { %v545_v22 = vpop.permute.xlu1 %544  ;;  %v601_v11 = vadd.f32 %v585_v56, %v1387_v16  ;;  %v602_v23 = vadd.f32 %v586_v7, %v1499_v62 }
 0x147   : > { %v543_v30 = vpop.permute.xlu0 %542  ;;  %v556_v6 = vsel %vm550_vm2, %v529_v0, %v545_v22  ;;  %v564_v34 = vsel %vm550_vm2, %v545_v22, %v529_v0  ;;  %v598_v22 = vadd.f32 %v582_v47, %v1471_v50  ;;  %v600_v14 = vadd.f32 %v584_v27, %v1505_v61 }
 0x148   : > { %v555_v58 = vsel %vm550_vm2, %v527_v38, %v543_v30  ;;  %v563_v17 = vsel %vm550_vm2, %v543_v30, %v527_v38  ;;  %v589_v0 = vmul.f32 %v1613_v31, %v564_v34  ;;  %v590_v9 = vmul.f32 %v1616_v24, %v556_v6 }
 0x149   : > { %v595_v38 = vadd.f32 %v579_v15, %v2165_v46  ;;  %v596_v30 = vadd.f32 %v580_v1, %v1477_v36  ;;  %v587_v41 = vmul.f32 %v1613_v31, %v563_v17  ;;  %v588_v48 = vmul.f32 %v1616_v24, %v555_v58 }
 0x14a   : > { %v1604_v3 = vpop.permute.xlu1 %548  ;;  %v605_v36 = vadd.f32 %v589_v0, %v1411_v44  ;;  %v606_v16 = vadd.f32 %v590_v9, %v1519_v20 }
 0x14b   : > { %v547_v42 = vpop.permute.xlu0 %546  ;;  %v603_v44 = vadd.f32 %v587_v41, %v1413_v52  ;;  %v604_v20 = vadd.f32 %v588_v48, %v1522_v25 }
 0x14c   : > { %v557_v45 = vsel %vm550_vm2, %v531_v39, %v547_v42  ;;  %v565_v51 = vsel %vm550_vm2, %v547_v42, %v531_v39  ;;  %v599_v39 = vadd.f32 %v583_v19, %v1389_v33 }
 0x14d   : > { %v591_v50 = vmul.f32 %v1613_v31, %v565_v51  ;;  %v592_v46 = vmul.f32 %v1616_v24, %v557_v45 }
 0x14e   : > { %v614_v10 = vpop.permute.xlu1 %613 }
 0x14f   : > { %v612_v43 = vpop.permute.xlu0 %611  ;;  %v608_v2 = vadd.f32 %v592_v46, %v1532_v53 }
 0x152   : > { %v1610_v63 = vpop.permute.xlu1 %617 }
 0x153   : > { %v1618_v32 = vpop.permute.xlu0 %615 }
 0x156   : > { %v1632_v5 = vpop.permute.xlu1 %621 }
 0x157   : > { %v1644_v26 = vpop.permute.xlu0 %619 }
 0x15a   : > { %v1666_v28 = vpop.permute.xlu1 %625 }
 0x15b   : > { %v1674_v21 = vpop.permute.xlu0 %623 }
 0x15e   : > { %v630_v42 = vpop.permute.xlu1 %629 }
 0x15f   : > { %v645_v62 = vsel %vm643_vm3, %v614_v10, %v630_v42  ;;  %v653_v49 = vsel %vm643_vm3, %v630_v42, %v614_v10  ;;  %v628_v4 = vpop.permute.xlu0 %627  ;;  %v607_v10 = vadd.f32 %v591_v50, %v1445_v57 }
 0x160   : > { %v674_v33 = vmul.f32 %v1655_v35, %v645_v62  ;;  %v675_v61 = vmul.f32 %v1658_v55, %v653_v49  ;;  %v644_v13 = vsel %vm643_vm3, %v612_v43, %v628_v4  ;;  %v652_v40 = vsel %vm643_vm3, %v628_v4, %v612_v43 }
 0x161   : > { %v672_v60 = vmul.f32 %v1655_v35, %v644_v13  ;;  %v673_v47 = vmul.f32 %v1658_v55, %v652_v40 }
 0x162   : > { %v1707_v18 = vadd.f32 %v674_v33, %v597_v29  ;;  %v1709_v15 = vadd.f32 %v675_v61, %v598_v22  ;;  %v634_v1 = vpop.permute.xlu1 %633 }
 0x163   : > { %v1711_v6 = vadd.f32 %v672_v60, %v595_v38  ;;  %v1713_v43 = vadd.f32 %v673_v47, %v596_v30  ;;  %v647_v52 = vsel %vm643_vm3, %v1610_v63, %v634_v1  ;;  %v655_v25 = vsel %vm643_vm3, %v634_v1, %v1610_v63  ;;  %v632_v57 = vpop.permute.xlu0 %631 }
 0x164   : > { %v678_v53 = vmul.f32 %v1655_v35, %v647_v52  ;;  %v679_v34 = vmul.f32 %v1658_v55, %v655_v25  ;;  %v646_v56 = vsel %vm643_vm3, %v1618_v32, %v632_v57  ;;  %v654_v7 = vsel %vm643_vm3, %v632_v57, %v1618_v32 }
 0x165   : > { %v676_v19 = vmul.f32 %v1655_v35, %v646_v56  ;;  %v677_v27 = vmul.f32 %v1658_v55, %v654_v7  ;;  %v706_v58 = vrot.slane %v1707_v18, 7  ;;  %v707_v63 = vrot.slane %v1709_v15, 7 }
 0x166   : > { %v1733_v17 = vadd.f32 %v678_v53, %v601_v11  ;;  %v1735_v0 = vadd.f32 %v679_v34, %v602_v23  ;;  %v638_v9 = vpop.permute.xlu1 %637  ;;  %v704_v45 = vrot.slane %v1711_v6, 7  ;;  %v705_v51 = vrot.slane %v1713_v43, 7 }
 0x167   : > { %v1739_v29 = vadd.f32 %v676_v19, %v599_v39  ;;  %v1741_v32 = vadd.f32 %v677_v27, %v600_v14  ;;  %v649_v22 = vsel %vm643_vm3, %v1632_v5, %v638_v9  ;;  %v657_v38 = vsel %vm643_vm3, %v638_v9, %v1632_v5  ;;  %v636_v30 = vpop.permute.xlu0 %635 }
 0x168   : > { %v682_v11 = vmul.f32 %v1655_v35, %v649_v22  ;;  %v683_v23 = vmul.f32 %v1658_v55, %v657_v38  ;;  %v648_v41 = vsel %vm643_vm3, %v1644_v26, %v636_v30  ;;  %v656_v48 = vsel %vm643_vm3, %v636_v30, %v1644_v26 }
 0x169   : > { %v680_v39 = vmul.f32 %v1655_v35, %v648_v41  ;;  %v681_v14 = vmul.f32 %v1658_v55, %v656_v48  ;;  %v735_v5 = vsel %vm722_vm4, %v704_v45, %v706_v58  ;;  %v736_v50 = vsel %vm722_vm4, %v705_v51, %v707_v63 }
 0x16a   : > { %v1768_v46 = vadd.f32 %v682_v11, %v605_v36  ;;  %v1770_v42 = vadd.f32 %v683_v23, %v606_v16  ;;  %v708_v26 = vrot.slane %v1739_v29, 7  ;;  %v709_v62 = vrot.slane %v1741_v32, 7 }
 0x16b   : > { %v1774_v49 = vadd.f32 %v680_v39, %v603_v44  ;;  %v1776_v4 = vadd.f32 %v681_v14, %v604_v20  ;;  %v640_v33 = vpop.permute.xlu0 %639  ;;  %v710_v61 = vrot.slane %v1733_v17, 7  ;;  %v711_v13 = vrot.slane %v1735_v0, 7 }
 0x16c   : > { %v650_v36 = vsel %vm643_vm3, %v1674_v21, %v640_v33  ;;  %v658_v16 = vsel %vm643_vm3, %v640_v33, %v1674_v21  ;;  %v1788_v40 = vsel %vm722_vm4, %v706_v58, %v708_v26  ;;  %v1792_v44 = vsel %vm722_vm4, %v707_v63, %v709_v62 }
 0x16d   : > { %v684_v20 = vmul.f32 %v1655_v35, %v650_v36  ;;  %v685_v60 = vmul.f32 %v1658_v55, %v658_v16  ;;  %v1798_v47 = vsel %vm722_vm4, %v708_v26, %v710_v61  ;;  %v1802_v1 = vsel %vm722_vm4, %v709_v62, %v711_v13 }
 0x16e   : > { %v712_v21 = vrot.slane %v1774_v49, 7  ;;  %v713_v52 = vrot.slane %v1776_v4, 7  ;;  %v714_v25 = vrot.slane %v1768_v46, 7  ;;  %v715_v57 = vrot.slane %v1770_v42, 7 }
 0x16f   : > { %v1808_v53 = vadd.f32 %v684_v20, %v607_v10  ;;  %v1810_v34 = vadd.f32 %v685_v60, %v608_v2  ;;  %v821_v56 = vrot.slane %v1707_v18, 1  ;;  %v822_v7 = vrot.slane %v1709_v15, 1 }
 0x170   : > { %v1816_v19 = vsel %vm722_vm4, %v710_v61, %v712_v21  ;;  %v1820_v27 = vsel %vm722_vm4, %v711_v13, %v713_v52  ;;  %v1824_v58 = vsel %vm722_vm4, %v712_v21, %v714_v25  ;;  %v1828_v10 = vsel %vm722_vm4, %v713_v52, %v715_v57 }
 0x171   : > { %v2157_v2 = vrot.slane %v1808_v53, 7  ;;  %v2156_v63 = vrot.slane %v1810_v34, 7  ;;  %v2155_v9 = vrot.slane %v1711_v6, 1  ;;  %v2154_v22 = vrot.slane %v1713_v43, 1 }
 0x172   : > { %v823_v38 = vrot.slane %v1739_v29, 1  ;;  %v824_v30 = vrot.slane %v1741_v32, 1  ;;  %v825_v11 = vrot.slane %v1733_v17, 1  ;;  %v826_v23 = vrot.slane %v1735_v0, 1 }
 0x173   : > { %v1842_v41 = vsel %vm722_vm4, %v714_v25, %v2157_v2  ;;  %v1848_v48 = vsel %vm722_vm4, %v715_v57, %v2156_v63  ;;  %v1854_v39 = vsel %vm835_vm5, %v2155_v9, %v821_v56  ;;  %v1860_v14 = vsel %vm835_vm5, %v2154_v22, %v822_v7 }
 0x174   : > { %v1864_v26 = vsel %vm835_vm5, %v821_v56, %v823_v38  ;;  %v1868_v62 = vsel %vm835_vm5, %v822_v7, %v824_v30  ;;  %v1872_v33 = vsel %vm835_vm5, %v823_v38, %v825_v11  ;;  %v1876_v61 = vsel %vm835_vm5, %v824_v30, %v826_v23 }
 0x175   : > { %v827_v13 = vrot.slane %v1774_v49, 1  ;;  %v828_v36 = vrot.slane %v1776_v4, 1  ;;  %v829_v16 = vrot.slane %v1768_v46, 1  ;;  %v830_v20 = vrot.slane %v1770_v42, 1 }
 0x176   : > { %v558_v60 = vsel %vm550_vm2, %v1602_v8, %v1604_v3  ;;  %v566_v21 = vsel %vm550_vm2, %v1604_v3, %v1602_v8  ;;  %v831_v52 = vrot.slane %v1808_v53, 1  ;;  %v832_v25 = vrot.slane %v1810_v34, 1 }
 0x177   : > { %v755_v57 = vpop.permute.xlu1 %754  ;;  %v1894_v56 = vsel %vm835_vm5, %v825_v11, %v827_v13  ;;  %v1898_v7 = vsel %vm835_vm5, %v826_v23, %v828_v36  ;;  %v1902_v38 = vsel %vm835_vm5, %v827_v13, %v829_v16  ;;  %v1906_v8 = vsel %vm835_vm5, %v828_v36, %v830_v20 }
 0x178   : > { %v789_v3 = vmul.f32 %v755_v57, %v735_v5  ;;  %v790_v30 = vmul.f32 %v755_v57, %v736_v50  ;;  %v1910_v22 = vsel %vm835_vm5, %v829_v16, %v831_v52  ;;  %v1914_v11 = vsel %vm835_vm5, %v830_v20, %v832_v25 }
 0x179   : > { %v593_v23 = vmul.f32 %v1613_v31, %v566_v21  ;;  %v594_v9 = vmul.f32 %v1616_v24, %v558_v60 }
 0x17a   : > { %v1919_v13 = vadd.f32 %v789_v3, %v1707_v18  ;;  %v1922_v36 = vadd.f32 %v790_v30, %v1709_v15 }
 0x17b   : > { %v642_v5 = vpop.permute.xlu1 %641  ;;  %v609_v31 = vadd.f32 %v593_v23, %v1443_v54  ;;  %v610_v24 = vadd.f32 %v594_v9, %v1530_v59 }
 0x17c   : > { %v651_v50 = vsel %vm643_vm3, %v1666_v28, %v642_v5  ;;  %v659_v16 = vsel %vm643_vm3, %v642_v5, %v1666_v28  ;;  %v750_v20 = vpop.permute.xlu0 %749 }
 0x17d   : > { %v686_v18 = vmul.f32 %v1655_v35, %v651_v50  ;;  %v687_v60 = vmul.f32 %v1658_v55, %v659_v16 }
 0x17f   : > { %v702_v15 = vadd.f32 %v686_v18, %v609_v31  ;;  %v703_v21 = vadd.f32 %v687_v60, %v610_v24  ;;  %v760_v57 = vpop.permute.xlu1 %759 }
 0x180   : > { %v791_v3 = vmul.f32 %v760_v57, %v1788_v40  ;;  %v792_v30 = vmul.f32 %v760_v57, %v1792_v44  ;;  %v765_v63 = vpop.permute.xlu0 %764 }
 0x181   : > { %v718_v2 = vrot.slane %v702_v15, 7  ;;  %v719_v37 = vrot.slane %v703_v21, 7  ;;  %v793_v28 = vmul.f32 %v765_v63, %v1798_v47  ;;  %v794_v54 = vmul.f32 %v765_v63, %v1802_v1 }
 0x182   : > { %v1939_v59 = vadd.f32 %v791_v3, %v1739_v29  ;;  %v1942_v35 = vadd.f32 %v792_v30, %v1741_v32  ;;  %v833_v55 = vrot.slane %v702_v15, 1  ;;  %v834_v9 = vrot.slane %v703_v21, 1 }
 0x183   : > { %v737_v40 = vsel %vm722_vm4, %v718_v2, %v704_v45  ;;  %v738_v44 = vsel %vm722_vm4, %v719_v37, %v705_v51  ;;  %v1953_v47 = vadd.f32 %v793_v28, %v1733_v17  ;;  %v1956_v29 = vadd.f32 %v794_v54, %v1735_v0  ;;  %v770_v32 = vpop.permute.xlu1 %769 }
 0x184   : > { %v787_v1 = vmul.f32 %v750_v20, %v737_v40  ;;  %v788_v63 = vmul.f32 %v750_v20, %v738_v44  ;;  %v795_v23 = vmul.f32 %v770_v32, %v1816_v19  ;;  %v796_v5 = vmul.f32 %v770_v32, %v1820_v27  ;;  %v775_v50 = vpop.permute.xlu0 %774 }
 0x185   : > { %v797_v45 = vmul.f32 %v775_v50, %v1824_v58  ;;  %v798_v16 = vmul.f32 %v775_v50, %v1828_v10  ;;  %v2168_v51 = vrot.slane %v1808_v53, 7  ;;  %v2169_v0 = vrot.slane %v1810_v34, 7 }
 0x186   : > { %v803_v20 = vadd.f32 %v787_v1, %v1711_v6  ;;  %v804_v19 = vadd.f32 %v788_v63, %v1713_v43  ;;  %v1973_v27 = vadd.f32 %v795_v23, %v1774_v49  ;;  %v1976_v58 = vadd.f32 %v796_v5, %v1776_v4 }
 0x187   : > { %v723_v17 = vsel %vm722_vm4, %v2168_v51, %v718_v2  ;;  %v724_v31 = vsel %vm722_vm4, %v2169_v0, %v719_v37  ;;  %v1979_v10 = vadd.f32 %v797_v45, %v1768_v46  ;;  %v1982_v2 = vadd.f32 %v798_v16, %v1770_v42  ;;  %v780_v24 = vpop.permute.xlu1 %779  ;;  %v1084_v45 = vld [vmem:[%s1174_s11] sm:$0xff]  ;;  %v1085_v51 = vld [vmem:[%s1174_s11 + $0x8] sm:$0xff] }
 0x188   : > { %v1986_v18 = vsel %vm835_vm5, %v831_v52, %v833_v55  ;;  %v1990_v60 = vsel %vm835_vm5, %v832_v25, %v834_v9  ;;  %v799_v49 = vmul.f32 %v780_v24, %v1842_v41  ;;  %v800_v4 = vmul.f32 %v780_v24, %v1848_v48  ;;  %v785_v57 = vpop.permute.xlu0 %784  ;;  %v1087_v24 = vld [vmem:[%s1174_s11 + $0x18] sm:$0xff] }
 0x189   : > { %v2170_v46 = vrot.slane %v1711_v6, 1  ;;  %v2171_v3 = vrot.slane %v1713_v43, 1  ;;  %v801_v48 = vmul.f32 %v785_v57, %v723_v17  ;;  %v802_v30 = vmul.f32 %v785_v57, %v724_v31  ;;  %v933_v43 = vld [vmem:[%s2137_s1 + $0x8] sm:$0xff] }
 0x18a   : > { %v2007_v25 = vadd.f32 %v799_v49, %v1808_v53  ;;  %v2010_v41 = vadd.f32 %v800_v4, %v1810_v34 }
 0x18b   : > { %v1998_v42 = vsel %vm835_vm5, %v833_v55, %v2170_v46  ;;  %v2004_v52 = vsel %vm835_vm5, %v834_v9, %v2171_v3  ;;  %v863_v37 = vpop.permute.xlu1 %862  ;;  %v2028_v40 = vadd.f32 %v801_v48, %v702_v15  ;;  %v2030_v44 = vadd.f32 %v802_v30, %v703_v21 }
 0x18c   : > { %v900_v6 = vmul.f32 %v863_v37, %v1854_v39  ;;  %v901_v28 = vmul.f32 %v863_v37, %v1860_v14  ;;  %v868_v54 = vpop.permute.xlu0 %867  ;;  %v934_v39 = vld [vmem:[%s2137_s1 + $0x10] sm:$0xff]  ;;  %v935_v14 = vld [vmem:[%s2137_s1 + $0x18] sm:$0xff] }
 0x18d   : > { %v902_v53 = vmul.f32 %v868_v54, %v1864_v26  ;;  %v903_v34 = vmul.f32 %v868_v54, %v1868_v62 }
 0x18e   : > { %v916_v55 = vadd.f32 %v900_v6, %v803_v20  ;;  %v917_v9 = vadd.f32 %v901_v28, %v804_v19  ;;  %v938_v20 = vld [vmem:[%s2137_s1 + $0x30] sm:$0xff]  ;;  %v941_v6 = vld [vmem:[%s2137_s1 + $0x48] sm:$0xff] }
 0x18f   : > { %v918_v26 = vadd.f32 %v902_v53, %v1919_v13  ;;  %v919_v32 = vadd.f32 %v903_v34, %v1922_v36  ;;  %v873_v62 = vpop.permute.xlu1 %872  ;;  %v936_v36 = vld [vmem:[%s2137_s1 + $0x20] sm:$0xff] }
 0x190   : > { %v948_v1 = vmul.f32 %v932_v12, %v916_v55  ;;  %v949_v63 = vmul.f32 %v933_v43, %v917_v9  ;;  %v904_v23 = vmul.f32 %v873_v62, %v1872_v33  ;;  %v905_v5 = vmul.f32 %v873_v62, %v1876_v61  ;;  %v878_v50 = vpop.permute.xlu0 %877  ;;  %v937_v33 = vld [vmem:[%s2137_s1 + $0x28] sm:$0xff]  ;;  %v942_v55 = vld [vmem:[%s2137_s1 + $0x50] sm:$0xff] }
 0x191   : > { %v950_v15 = vmul.f32 %v934_v39, %v918_v26  ;;  %v951_v13 = vmul.f32 %v935_v14, %v919_v32  ;;  %v906_v61 = vmul.f32 %v878_v50, %v1894_v56  ;;  %v907_v21 = vmul.f32 %v878_v50, %v1898_v7  ;;  %v939_v56 = vld [vmem:[%s2137_s1 + $0x38] sm:$0xff]  ;;  %v1086_v7 = vld [vmem:[%s1174_s11 + $0x10] sm:$0xff]  ;;  %v1089_v12 = vld [vmem:[%s1174_s11 + $0x28] sm:$0xff] }
 0x192   : > { %v964_v16 = vsub.f32 %v948_v1, %v1084_v45  ;;  %v965_v17 = vsub.f32 %v949_v63, %v1085_v51  ;;  %v920_v0 = vadd.f32 %v904_v23, %v1939_v59  ;;  %v921_v31 = vadd.f32 %v905_v5, %v1942_v35  ;;  %v1091_v39 = vld [vmem:[%s1174_s11 + $0x38] sm:$0xff]  ;;  %v945_v50 = vld [vmem:[%s2137_s1 + $0x68] sm:$0xff]  ;;  %v946_v45 = vld [vmem:[%s2137_s1 + $0x70] sm:$0xff] }
 0x193   : > { %v966_v19 = vsub.f32 %v950_v15, %v1086_v7  ;;  %v967_v49 = vsub.f32 %v951_v13, %v1087_v24  ;;  %v922_v4 = vadd.f32 %v906_v61, %v1953_v47  ;;  %v923_v59 = vadd.f32 %v907_v21, %v1956_v29  ;;  %v883_v57 = vpop.permute.xlu1 %882  ;;  %v940_v29 = vld [vmem:[%s2137_s1 + $0x40] sm:$0xff]  ;;  %v1095_v51 = vld [vmem:[%s1174_s11 + $0x58] sm:$0xff]  ;;  %v1097_v24 = vld [vmem:[%s1174_s11 + $0x68] sm:$0xff] }
 0x194   : > { %980 = vst [vmem:[%s2041_s12] sm:$0xff] %v964_v16  ;;  %981 = vst [vmem:[%s2041_s12 + $0x8] sm:$0xff] %v965_v17  ;;  %v952_v35 = vmul.f32 %v936_v36, %v920_v0  ;;  %v953_v46 = vmul.f32 %v937_v33, %v921_v31  ;;  %v908_v3 = vmul.f32 %v883_v57, %v1902_v38  ;;  %v888_v30 = vpop.permute.xlu0 %887  ;;  %v1093_v36 = vld [vmem:[%s1174_s11 + $0x48] sm:$0xff]  ;;  %v1096_v7 = vld [vmem:[%s1174_s11 + $0x60] sm:$0xff] }
 0x195   : > { %v909_v48 = vmul.f32 %v883_v57, %v1906_v8  ;;  %982 = vst [vmem:[%s2041_s12 + $0x10] sm:$0xff] %v966_v19  ;;  %983 = vst [vmem:[%s2041_s12 + $0x18] sm:$0xff] %v967_v49  ;;  %v954_v37 = vmul.f32 %v938_v20, %v922_v4  ;;  %v955_v47 = vmul.f32 %v939_v56, %v923_v59  ;;  %v1088_v8 = vld [vmem:[%s1174_s11 + $0x20] sm:$0xff]  ;;  %v1099_v59 = vld [vmem:[%s1174_s11 + $0x78] sm:$0xff] }
 0x196   : > { %v910_v28 = vmul.f32 %v888_v30, %v1910_v22  ;;  %v911_v38 = vmul.f32 %v888_v30, %v1914_v11  ;;  %v968_v54 = vsub.f32 %v952_v35, %v1088_v8  ;;  %v969_v43 = vsub.f32 %v953_v46, %v1089_v12  ;;  %v943_v22 = vld [vmem:[%s2137_s1 + $0x58] sm:$0xff]  ;;  %v1090_v11 = vld [vmem:[%s1174_s11 + $0x30] sm:$0xff] }
 0x197   : > { %v924_v53 = vadd.f32 %v908_v3, %v1973_v27  ;;  %v925_v34 = vadd.f32 %v909_v48, %v1976_v58  ;;  %v970_v9 = vsub.f32 %v954_v37, %v1090_v11  ;;  %v971_v14 = vsub.f32 %v955_v47, %v1091_v39  ;;  %v893_v32 = vpop.permute.xlu1 %892 }
 0x198   : > { %v926_v26 = vadd.f32 %v910_v28, %v1979_v10  ;;  %v927_v27 = vadd.f32 %v911_v38, %v1982_v2  ;;  %984 = vst [vmem:[%s2041_s12 + $0x20] sm:$0xff] %v968_v54  ;;  %985 = vst [vmem:[%s2041_s12 + $0x28] sm:$0xff] %v969_v43  ;;  %v912_v1 = vmul.f32 %v893_v32, %v1986_v18  ;;  %v898_v23 = vpop.permute.xlu0 %897  ;;  %v944_v2 = vld [vmem:[%s2137_s1 + $0x60] sm:$0xff] }
 0x199   : > { %v956_v58 = vmul.f32 %v940_v29, %v924_v53  ;;  %v957_v62 = vmul.f32 %v941_v6, %v925_v34  ;;  %v913_v63 = vmul.f32 %v893_v32, %v1990_v60  ;;  %986 = vst [vmem:[%s2041_s12 + $0x30] sm:$0xff] %v970_v9  ;;  %987 = vst [vmem:[%s2041_s12 + $0x38] sm:$0xff] %v971_v14  ;;  %v1092_v60 = vld [vmem:[%s1174_s11 + $0x40] sm:$0xff] }
 0x19a   : > { %v958_v5 = vmul.f32 %v942_v55, %v926_v26  ;;  %v959_v10 = vmul.f32 %v943_v22, %v927_v27  ;;  %v914_v15 = vmul.f32 %v898_v23, %v1998_v42  ;;  %v915_v18 = vmul.f32 %v898_v23, %v2004_v52  ;;  %v947_v42 = vld [vmem:[%s2137_s1 + $0x78] sm:$0xff]  ;;  %v1094_v52 = vld [vmem:[%s1174_s11 + $0x50] sm:$0xff] }
 0x19b   : > { %v972_v13 = vsub.f32 %v956_v58, %v1092_v60  ;;  %v973_v33 = vsub.f32 %v957_v62, %v1093_v36  ;;  %v928_v61 = vadd.f32 %v912_v1, %v2007_v25  ;;  %v929_v21 = vadd.f32 %v913_v63, %v2010_v41 }
 0x19c   : > { %v974_v16 = vsub.f32 %v958_v5, %v1094_v52  ;;  %v975_v17 = vsub.f32 %v959_v10, %v1095_v51  ;;  %v930_v0 = vadd.f32 %v914_v15, %v2028_v40  ;;  %v931_v25 = vadd.f32 %v915_v18, %v2030_v44  ;;  %v1098_v40 = vld [vmem:[%s1174_s11 + $0x70] sm:$0xff] }
 0x19d   : > { %988 = vst [vmem:[%s2041_s12 + $0x40] sm:$0xff] %v972_v13  ;;  %989 = vst [vmem:[%s2041_s12 + $0x48] sm:$0xff] %v973_v33  ;;  %v960_v41 = vmul.f32 %v944_v2, %v928_v61  ;;  %v961_v31 = vmul.f32 %v945_v50, %v929_v21 }
 0x19e   : > { %990 = vst [vmem:[%s2041_s12 + $0x50] sm:$0xff] %v974_v16  ;;  %991 = vst [vmem:[%s2041_s12 + $0x58] sm:$0xff] %v975_v17  ;;  %v962_v20 = vmul.f32 %v946_v45, %v930_v0  ;;  %v963_v56 = vmul.f32 %v947_v42, %v931_v25 }
 0x19f   : > { %v976_v19 = vsub.f32 %v960_v41, %v1096_v7  ;;  %v977_v49 = vsub.f32 %v961_v31, %v1097_v24 }
 0x1a0   : > { %v978_v4 = vsub.f32 %v962_v20, %v1098_v40  ;;  %v979_v44 = vsub.f32 %v963_v56, %v1099_v59 }
 0x1a1   : > { %992 = vst [vmem:[%s2041_s12 + $0x60] sm:$0xff] %v976_v19  ;;  %993 = vst [vmem:[%s2041_s12 + $0x68] sm:$0xff] %v977_v49 }
 0x1a2   : > { %994 = vst [vmem:[%s2041_s12 + $0x70] sm:$0xff] %v978_v4  ;;  %995 = vst [vmem:[%s2041_s12 + $0x78] sm:$0xff] %v979_v44 }
 0x1a3 PF: > { %s18_s27 = sadd.s32 1, %s1106_s27  }
 0x1a4   : > { %p15_p4 = scmp.ge.s32.totalorder %s18_s27, 4  }
 0x1a6   :  { %17 = sbr.rel (!%p15_p4) target bundleno = 1 (0x1), region = 82 }

</bundles_post_ra>
